<compile_context>
chip_gen: v6e
topology: v6e:2x2x1
jax: 0.10.0
libtpu: 0.0.40
codegen_flags: <defaults>
</compile_context>

<pallas_src>
import jax
import jax.numpy as jnp
from jax.experimental import pallas as pl
from jax.experimental.pallas import tpu as pltpu


def _round_up(x, m):
    return ((x + m - 1) // m) * m


# ---------------------------------------------------------------------------
# Kernels
# ---------------------------------------------------------------------------
def _fc_relu_kernel_2d(x_ref, w_ref, b_ref, o_ref):
    """Single-K-tile path: o = relu(x @ W + b) in one shot."""
    acc = jnp.dot(x_ref[...], w_ref[...], preferred_element_type=jnp.float32)
    acc = acc + b_ref[...].astype(jnp.float32)
    o_ref[...] = jnp.maximum(acc, 0.0).astype(o_ref.dtype)


def _fc_relu_kernel_3d_f32out(x_ref, w_ref, b_ref, o_ref):
    """K-tiled path, f32 output: accumulate directly into o_ref (no scratch)."""
    k = pl.program_id(2)

    @pl.when(k == 0)
    def _():
        o_ref[...] = jnp.zeros_like(o_ref)

    o_ref[...] += jnp.dot(x_ref[...], w_ref[...],
                          preferred_element_type=jnp.float32)

    @pl.when(k == pl.num_programs(2) - 1)
    def _():
        o_ref[...] = jnp.maximum(o_ref[...] + b_ref[...], 0.0)


def _fc_relu_kernel_3d_acc(x_ref, w_ref, b_ref, o_ref, acc_ref):
    """K-tiled path, narrow output dtype: accumulate in f32 VMEM scratch."""
    k = pl.program_id(2)

    @pl.when(k == 0)
    def _():
        acc_ref[...] = jnp.zeros_like(acc_ref)

    acc_ref[...] += jnp.dot(x_ref[...], w_ref[...],
                            preferred_element_type=jnp.float32)

    @pl.when(k == pl.num_programs(2) - 1)
    def _():
        out = acc_ref[...] + b_ref[...].astype(jnp.float32)
        o_ref[...] = jnp.maximum(out, 0.0).astype(o_ref.dtype)


# ---------------------------------------------------------------------------
# Wrapper
# ---------------------------------------------------------------------------
def fully_connected_relu(x, w_t, b, *, tm=512, tn=512, tk=512):
    """relu(x @ w_t + b).

    x:   (..., K) float32
    w_t: (K, N)   float32   (transposed PyTorch weight)
    b:   (N,)     float32
    """
    orig_shape = x.shape
    K = orig_shape[-1]
    K2, N = w_t.shape
    assert K == K2 and b.shape == (N,)

    x2 = x.reshape(-1, K)
    M = x2.shape[0]

    # Tile sizes: clamp to (padded) problem size, keep (8,128) alignment.
    tm = min(tm, _round_up(M, 8))
    tn = min(tn, _round_up(N, 128))
    tk = min(tk, _round_up(K, 128))

    Mp = _round_up(M, tm)
    Np = _round_up(N, tn)
    Kp = _round_up(K, tk)

    # Zero-pad: padded K contributes 0 to the dot; padded rows/cols are
    # trimmed after the call.
    x_p = jnp.pad(x2, ((0, Mp - M), (0, Kp - K))) if (Mp != M or Kp != K) else x2
    w_p = jnp.pad(w_t, ((0, Kp - K), (0, Np - N))) if (Kp != K or Np != N) else w_t
    b_p = jnp.pad(b, (0, Np - N)) if Np != N else b
    b2 = b_p.reshape(1, Np)  # 2-D so it maps onto (sublane, lane)

    out_dtype = x.dtype

    # VMEM budget estimate (double-buffered x/W/bias/out + optional acc),
    # used to raise the scoped VMEM limit while staying v7x-safe (<= 48 MiB).
    est = 2 * (tm * tk + tk * tn + tm * tn + tn) * 4 + tm * tn * 4
    vmem_limit = max(32 << 20, min(int(est * 2), 48 << 20))

    n_k = Kp // tk
    grid_m, grid_n = Mp // tm, Np // tn

    if n_k == 1:
        # K fits in one tile: 2-D grid, no reduction axis, no scratch.
        out_p = pl.pallas_call(
            _fc_relu_kernel_2d,
            out_shape=jax.ShapeDtypeStruct((Mp, Np), out_dtype),
            grid_spec=pltpu.PrefetchScalarGridSpec(
                num_scalar_prefetch=0,
                grid=(grid_m, grid_n),
                in_specs=[
                    pl.BlockSpec((tm, tk), lambda i, j: (i, 0)),
                    pl.BlockSpec((tk, tn), lambda i, j: (0, j)),
                    pl.BlockSpec((1, tn), lambda i, j: (0, j)),
                ],
                out_specs=pl.BlockSpec((tm, tn), lambda i, j: (i, j)),
            ),
            compiler_params=pltpu.CompilerParams(
                dimension_semantics=("parallel", "parallel"),
                vmem_limit_bytes=vmem_limit,
            ),
        )(x_p, w_p, b2)
    else:
        grid = (grid_m, grid_n, n_k)
        in_specs = [
            pl.BlockSpec((tm, tk), lambda i, j, k: (i, k)),
            pl.BlockSpec((tk, tn), lambda i, j, k: (k, j)),
            pl.BlockSpec((1, tn), lambda i, j, k: (0, j)),
        ]
        out_spec = pl.BlockSpec((tm, tn), lambda i, j, k: (i, j))
        cparams = pltpu.CompilerParams(
            dimension_semantics=("parallel", "parallel", "arbitrary"),
            vmem_limit_bytes=vmem_limit,
        )
        if out_dtype == jnp.float32:
            # Accumulate directly into the (f32) output tile -> no scratch.
            out_p = pl.pallas_call(
                _fc_relu_kernel_3d_f32out,
                out_shape=jax.ShapeDtypeStruct((Mp, Np), out_dtype),
                grid_spec=pltpu.PrefetchScalarGridSpec(
                    num_scalar_prefetch=0, grid=grid,
                    in_specs=in_specs, out_specs=out_spec,
                ),
                compiler_params=cparams,
            )(x_p, w_p, b2)
        else:
            out_p = pl.pallas_call(
                _fc_relu_kernel_3d_acc,
                out_shape=jax.ShapeDtypeStruct((Mp, Np), out_dtype),
                grid_spec=pltpu.PrefetchScalarGridSpec(
                    num_scalar_prefetch=0, grid=grid,
                    in_specs=in_specs, out_specs=out_spec,
                    scratch_shapes=[pltpu.VMEM((tm, tn), jnp.float32)],
                ),
                compiler_params=cparams,
            )(x_p, w_p, b2)

    out = out_p[:M, :N]
    return out.reshape(*orig_shape[:-1], N)


# ---------------------------------------------------------------------------
# Module mirror
# ---------------------------------------------------------------------------
class FullyConnectedPallas:
    """Mirrors the PyTorch FullyConnected module: y = relu(Linear(x))."""

    def __init__(self, in_features, out_features, bias=True, key=None):
        self.in_features = in_features
        self.out_features = out_features
        if key is None:
            key = jax.random.PRNGKey(42)
        kw, kb = jax.random.split(key)
        bound = 1.0 / (in_features ** 0.5)
        # PyTorch weight is (out, in); we keep it transposed as (in, out).
        self.w_t = jax.random.uniform(
            kw, (in_features, out_features), jnp.float32, -bound, bound
        )
        if bias:
            self.b = jax.random.uniform(
                kb, (out_features,), jnp.float32, -bound, bound
            )
        else:
            self.b = jnp.zeros((out_features,), jnp.float32)

    def __call__(self, x):
        return fully_connected_relu(x, self.w_t, self.b)


if __name__ == "__main__":
    key = jax.random.PRNGKey(0)
    batch, in_features, out_features = 8, 32, 128

    x = jax.random.normal(key, (batch, in_features), jnp.float32)

    model = FullyConnectedPallas(in_features, out_features, bias=True,
                                 key=jax.random.PRNGKey(42))
    y = model(x)
    y = jax.block_until_ready(y)

    # Reference: relu(x @ W.T + b) == relu(x @ w_t + b).
    y_ref = jnp.maximum(x @ model.w_t + model.b, 0.0)
    assert y.shape == (batch, out_features)
    assert jnp.allclose(y, y_ref, atol=1e-5, rtol=1e-5)

    # Exercise the K-tiled (3-D grid) path too, with a non-divisible shape.
    M2, K2, N2 = 40, 600, 300
    x2 = jax.random.normal(jax.random.PRNGKey(1), (M2, K2), jnp.float32)
    w2 = jax.random.normal(jax.random.PRNGKey(2), (K2, N2), jnp.float32) * 0.05
    b2 = jax.random.normal(jax.random.PRNGKey(3), (N2,), jnp.float32)
    y2 = jax.block_until_ready(
        fully_connected_relu(x2, w2, b2, tm=32, tn=128, tk=256)
    )
    y2_ref = jnp.maximum(x2 @ w2 + b2, 0.0)
    assert jnp.allclose(y2, y2_ref, atol=1e-4, rtol=1e-4)

    print("KERNEL_OK")
</pallas_src>

<mosaic_0001>
module attributes {stable_mosaic.version = 11 : i64} {
  func.func @_fc_relu_kernel_2d(%arg0: i32, %arg1: i32, %arg2: memref<8x128xf32, #tpu.memory_space<vmem>>, %arg3: memref<128x128xf32, #tpu.memory_space<vmem>>, %arg4: memref<1x128xf32, #tpu.memory_space<vmem>>, %arg5: memref<8x128xf32, #tpu.memory_space<vmem>>) attributes {dimension_semantics = [#tpu.dimension_semantics<parallel>, #tpu.dimension_semantics<parallel>], iteration_bounds = array<i64: 1, 1>, scalar_prefetch = 0 : i64, scratch_operands = 0 : i64, tpu.core_type = #tpu.core_type<tc>, window_params = [{transform_indices = @transform_0, window_bounds = array<i64: 8, 128>}, {transform_indices = @transform_1, window_bounds = array<i64: 128, 128>}, {transform_indices = @transform_2, window_bounds = array<i64: 1, 128>}, {transform_indices = @transform_3, window_bounds = array<i64: 8, 128>}]} {
    %c0 = arith.constant 0 : index
    %c0_0 = arith.constant 0 : index
    %0 = vector.load %arg2[%c0, %c0_0] : memref<8x128xf32, #tpu.memory_space<vmem>>, vector<8x128xf32>
    %c0_1 = arith.constant 0 : index
    %c0_2 = arith.constant 0 : index
    %1 = vector.load %arg3[%c0_1, %c0_2] : memref<128x128xf32, #tpu.memory_space<vmem>>, vector<128x128xf32>
    %cst = arith.constant dense<0.000000e+00> : vector<8x128xf32>
    %2 = tpu.matmul %0, %1, %cst {dimension_numbers = #tpu.dot_dimension_numbers<[1], [0], [0], [1], [0, 0, 1, 1], [], []>} : vector<8x128xf32>, vector<128x128xf32>, vector<8x128xf32> -> vector<8x128xf32>
    %c0_3 = arith.constant 0 : index
    %c0_4 = arith.constant 0 : index
    %3 = vector.load %arg4[%c0_3, %c0_4] : memref<1x128xf32, #tpu.memory_space<vmem>>, vector<1x128xf32>
    %4 = vector.broadcast %3 : vector<1x128xf32> to vector<8x128xf32>
    %5 = arith.addf %2, %4 : vector<8x128xf32>
    %cst_5 = arith.constant 0.000000e+00 : f32
    %6 = vector.broadcast %cst_5 : f32 to vector<8x128xf32>
    %7 = arith.maximumf %5, %6 : vector<8x128xf32>
    %c0_6 = arith.constant 0 : index
    %c0_7 = arith.constant 0 : index
    %8 = vector.load %arg5[%c0_6, %c0_7] : memref<8x128xf32, #tpu.memory_space<vmem>>, vector<8x128xf32>
    tpu.vector_store %arg5[%c0_6, %c0_7], %7 {strides = array<i32>} : memref<8x128xf32, #tpu.memory_space<vmem>>, vector<8x128xf32>,
    return
  }
  func.func @transform_0(%arg0: i32, %arg1: i32) -> (i32, i32) {
    %c0_i32 = arith.constant 0 : i32
    %c0_i32_0 = arith.constant 0 : i32
    return %arg0, %c0_i32 : i32, i32
  }
  func.func @transform_1(%arg0: i32, %arg1: i32) -> (i32, i32) {
    %c0_i32 = arith.constant 0 : i32
    %c0_i32_0 = arith.constant 0 : i32
    return %c0_i32, %arg1 : i32, i32
  }
  func.func @transform_2(%arg0: i32, %arg1: i32) -> (i32, i32) {
    %c0_i32 = arith.constant 0 : i32
    %c0_i32_0 = arith.constant 0 : i32
    return %c0_i32, %arg1 : i32, i32
  }
  func.func @transform_3(%arg0: i32, %arg1: i32) -> (i32, i32) {
    %c0_i32 = arith.constant 0 : i32
    return %arg0, %arg1 : i32, i32
  }
}

</mosaic_0001>

<bundles_post_ra>
// kernel: tpu_custom_call.1
= control target key start
LH: loop header
LB: loop body
LE: loop exit
PB: predicated region body
PF: predicated region fallthrough
CT: control target
= control target key end

     0   :  { %8 = vsyncpa [#allocation3], 0  ;;  %s318_s0 = inlined_call_operand.hbm [shape: f32[8,128], index: 0, kind: input, shape index: {}]   ;;  %s319_s1 = inlined_call_operand.hbm [shape: f32[128,128], index: 1, kind: input, shape index: {}]   ;;  %s320_s2 = inlined_call_operand.vmem [shape: f32[1,128], index: 2, kind: input, shape index: {}]   ;;  %s321_s3 = inlined_call_operand.hbm [shape: f32[8,128], index: 3, kind: output, shape index: {}]  }
   0x1   :  { %9 = vsyncpa [#allocation6], 0 }
   0x2   :  { %10 = vsyncpa [#allocation4], 0  ;;  %s279_s12 = smov [#allocation2]   ;;  %s280_s14 = smov [#allocation5]  }
   0x3   :  { %s17_s13 = sshll.u32 %s279_s12, 4  ;;  %s26_s15 = sshll.u32 %s280_s14, 4  ;;  %s18_s13 = int_to_ptr.vmem [resolvable:$true] %s17_s13  ;;  %s27_s15 = int_to_ptr.vmem [resolvable:$true] %s26_s15 }
   0x4   :  { %s221_s16 = scalar_lea.vmem %s18_s13, 128  ;;  %p226_p1 = scmp.lt.s32.totalorder %s18_s13, %s18_s13 }
   0x5   :  { %p222_p0 = scmp.ne.s32.totalorder %s18_s13, %s221_s16  ;;  %p227_p2 = scmp.lt.s32.totalorder %s221_s16, %s221_s16 }
   0x7   :  { %p228_p3 = por %p227_p2, %p226_p1 }
   0x9   :  { %p229_p4 = pnand %p228_p3, %p222_p0 }
   0xb   :  { %232 = shalt.err (!%p229_p4)
}
   0xc   :  { %20 = dma.hbm_to_vmem [thread:$0]  %s318_s0, 128, %s18_s13, [#allocation3]  }
   0xd   :  { %s241_s19 = scalar_lea.vmem %s27_s15, 2048  ;;  %p246_p6 = scmp.lt.s32.totalorder %s27_s15, %s27_s15 }
   0xe   :  { %p242_p5 = scmp.ne.s32.totalorder %s27_s15, %s241_s19  ;;  %p247_p7 = scmp.lt.s32.totalorder %s241_s19, %s241_s19 }
  0x10   :  { %p248_p8 = por %p247_p7, %p246_p6 }
  0x12   :  { %p249_p9 = pnand %p248_p8, %p242_p5 }
  0x14   :  { %252 = shalt.err (!%p249_p9)
}
  0x15   :  { %s281_s20 = smov 128   ;;  %s282_s21 = smov 8  }
  0x16   :  { %32 = dma.hbm_to_vmem [thread:$0]  %s319_s1, 2048, %s27_s15, [#allocation6], %s281_s20, %s281_s20, %s282_s21  }
  0x17   :  { %273 = dma.done.wait [#allocation3], 128  }
  0x18   :  { %274 = vsyncadd [#allocation3], 4294967168 }
  0x19   :  { %275 = dma.done.wait [#allocation6], 2048  }
  0x1a   :  { %276 = vsyncadd [#allocation6], 4294965248  ;;  %v283_v0 = vmov 0.0   ;;  %vm284_vm0 = vmmov 0   ;;  %v57_v1 = vld [vmem:[#allocation5 + $0x78] sm:$0xff]  ;;  %v56_v2 = vld [vmem:[#allocation5 + $0x70] sm:$0xff] }
  0x1b   :  { %171 = vmatprep.subr.mxu0 %v283_v0  ;;  %203 = vmatprep.mubr.msk.f32.mxu0 %vm284_vm0, %v283_v0  ;;  %v55_v3 = vld [vmem:[#allocation5 + $0x68] sm:$0xff]  ;;  %v54_v4 = vld [vmem:[#allocation5 + $0x60] sm:$0xff]  ;;  %v53_v5 = vld [vmem:[#allocation5 + $0x58] sm:$0xff]  ;;  %s285_s24 = smov [#allocation7]  }
  0x1c   :  { %172 = vmatpush3.msra.mxu0 %v57_v1  ;;  %v52_v6 = vld [vmem:[#allocation5 + $0x50] sm:$0xff]  ;;  %v51_v7 = vld [vmem:[#allocation5 + $0x48] sm:$0xff]  ;;  %v50_v8 = vld [vmem:[#allocation5 + $0x40] sm:$0xff]  ;;  %s143_s25 = sshll.u32 %s285_s24, 4  ;;  %s144_s25 = int_to_ptr.vmem [resolvable:$true] %s143_s25 }
  0x1d   :  { %173 = vmatprep.subr.mxu0 %v283_v0  ;;  %v49_v9 = vld [vmem:[#allocation5 + $0x38] sm:$0xff]  ;;  %v48_v10 = vld [vmem:[#allocation5 + $0x30] sm:$0xff]  ;;  %v47_v11 = vld [vmem:[#allocation5 + $0x28] sm:$0xff]  ;;  %s253_s26 = scalar_lea.vmem %s144_s25, 128  ;;  %p258_p11 = scmp.lt.s32.totalorder %s144_s25, %s144_s25 }
  0x1e   :  { %174 = vmatpush3.msra.mxu0 %v56_v2  ;;  %v46_v12 = vld [vmem:[#allocation5 + $0x20] sm:$0xff]  ;;  %v45_v13 = vld [vmem:[#allocation5 + $0x18] sm:$0xff]  ;;  %v44_v14 = vld [vmem:[#allocation5 + $0x10] sm:$0xff]  ;;  %p254_p10 = scmp.ne.s32.totalorder %s144_s25, %s253_s26  ;;  %p259_p12 = scmp.lt.s32.totalorder %s253_s26, %s253_s26 }
  0x1f   :  { %175 = vmatprep.subr.mxu0 %v283_v0  ;;  %v43_v15 = vld [vmem:[#allocation5 + $0x8] sm:$0xff]  ;;  %v42_v16 = vld [vmem:[#allocation5] sm:$0xff]  ;;  %v41_v17 = vld [vmem:[#allocation2] sm:$0xff] }
  0x20   :  { %176 = vmatpush3.msra.mxu0 %v55_v3  ;;  %v153_v18 = vld [vmem:[%s320_s2] ss:$0 sm:$0xff]  ;;  %p260_p13 = por %p259_p12, %p258_p11 }
  0x21   :  { %177 = vmatprep.subr.mxu0 %v283_v0 }
  0x22   :  { %178 = vmatpush3.msra.mxu0 %v54_v4  ;;  %p261_p0 = pnand %p260_p13, %p254_p10 }
  0x23   :  { %179 = vmatprep.subr.mxu0 %v283_v0 }
  0x24   :  { %180 = vmatpush3.msra.mxu0 %v53_v5 }
  0x25   :  { %181 = vmatprep.subr.mxu0 %v283_v0 }
  0x26   :  { %182 = vmatpush3.msra.mxu0 %v52_v6 }
  0x27   :  { %183 = vmatprep.subr.mxu0 %v283_v0 }
  0x28   :  { %184 = vmatpush3.msra.mxu0 %v51_v7 }
  0x29   :  { %185 = vmatprep.subr.mxu0 %v283_v0 }
  0x2a   :  { %186 = vmatpush3.msra.mxu0 %v50_v8 }
  0x2b   :  { %187 = vmatprep.subr.mxu0 %v283_v0 }
  0x2c   :  { %188 = vmatpush3.msra.mxu0 %v49_v9 }
  0x2d   :  { %189 = vmatprep.subr.mxu0 %v283_v0 }
  0x2e   :  { %190 = vmatpush3.msra.mxu0 %v48_v10 }
  0x2f   :  { %191 = vmatprep.subr.mxu0 %v283_v0 }
  0x30   :  { %192 = vmatpush3.msra.mxu0 %v47_v11 }
  0x31   :  { %193 = vmatprep.subr.mxu0 %v283_v0 }
  0x32   :  { %194 = vmatpush3.msra.mxu0 %v46_v12 }
  0x33   :  { %195 = vmatprep.subr.mxu0 %v283_v0 }
  0x34   :  { %196 = vmatpush3.msra.mxu0 %v45_v13 }
  0x35   :  { %197 = vmatprep.subr.mxu0 %v283_v0 }
  0x36   :  { %198 = vmatpush3.msra.mxu0 %v44_v14 }
  0x37   :  { %199 = vmatprep.subr.mxu0 %v283_v0 }
  0x38   :  { %200 = vmatpush3.msra.mxu0 %v43_v15 }
  0x39   :  { %201 = vmatprep.subr.mxu0 %v283_v0 }
  0x3a   :  { %202 = vmatpush3.msra.mxu0 %v42_v16 }
  0x3b   :  { %204 = vmatmul.mubr.f32.vlgmr.msra.gmra.mxu0 %v41_v17 }
  0xfb   :  { %v131_v19 = vpop.f32.mrf.mxu0 }
  0xfc   :  { %v132_v20 = vadd.f32 %v153_v18, %v131_v19 }
  0xfd   :  { %v205_v21 = vpop.f32.mrf.mxu0 }
  0xfe   :  { %v135_v22 = vmax.f32 %v132_v20, 0.0 }
 0x100   :  { %136 = vst [vmem:[#allocation7] sm:$0xff] %v135_v22 }
 0x101   :  { %264 = shalt.err (!%p261_p0)
}
 0x102   :  { %146 = dma.vmem_to_hbm [thread:$0]  %s144_s25, 128, %s321_s3, [#allocation4]  }
 0x103   :  { %277 = dma.done.wait [#allocation4], 128  }
 0x104   :  { %278 = vsyncadd [#allocation4], 4294967168 }
 0x105   :  { %150 = vsyncpa [#allocation3], 1 }
 0x106   :  { %151 = vsyncpa [#allocation6], 1 }
 0x107   :  { %152 = vsyncpa [#allocation4], 1 }

</bundles_post_ra>
